<compile_context>
chip_gen: v7x
topology: tpu7x:2x2x1
jax: 0.10.0
libtpu: 0.0.40
codegen_flags: <defaults>
</compile_context>

<pallas_src>
import jax
import jax.numpy as jnp
from jax import lax
from jax.experimental import pallas as pl
from jax.experimental.pallas import tpu as pltpu

LANE = 128
_VMEM_LIMIT = 32 * 1024 * 1024  # safe on v5e/v6e/v7x; >> our per-tile needs


def _pick_tile_m(m, row_bytes, budget_bytes=8 * 1024 * 1024):
    """Largest tile that divides m, fits the (double-buffered) VMEM budget,
    and leaves >=2 grid steps when possible so the pipeline is real."""
    cap = max(8, budget_bytes // max(row_bytes, 1))
    for t in (1024, 512, 256, 128, 64, 32, 16, 8):
        if t <= cap and t < m and m % t == 0:
            return t
    return m  # fallback: single block (block dim == array dim is legal)


# ----------------------------- Pallas kernels ------------------------------ #

def _matmul_stats_kernel(p_ref, w_ref, sum_ref, sq_ref):
    """Conv pre-activation (im2col matmul) -> per-tile partial BN statistics.
    The pre-activation itself is NOT written back (recomputed in pass 2)."""
    m = jnp.dot(p_ref[...], w_ref[...], preferred_element_type=jnp.float32)
    sum_ref[...] = jnp.sum(m, axis=0, keepdims=True)[None]      # (1,1,Cp)
    sq_ref[...] = jnp.sum(m * m, axis=0, keepdims=True)[None]   # (1,1,Cp)


def _matmul_bias_relu_kernel(x_ref, w_ref, b_ref, o_ref):
    """Fused matmul + per-channel add + ReLU.  Shared by:
       * pool branch  (AvgPool folded into W, b = conv bias)
       * conv branch  (BN folded into W_eff / b_eff)."""
    y = jnp.dot(x_ref[...], w_ref[...], preferred_element_type=jnp.float32)
    o_ref[...] = jnp.maximum(y + b_ref[...], 0.0)


def _tiled_matmul_bias_relu(x, w, b, tm):
    M, K = x.shape
    Cp = w.shape[1]
    nt = M // tm
    return pl.pallas_call(
        _matmul_bias_relu_kernel,
        out_shape=jax.ShapeDtypeStruct((M, Cp), jnp.float32),
        grid=(nt,),
        in_specs=[
            pl.BlockSpec((tm, K), lambda i: (i, 0)),
            pl.BlockSpec((K, Cp), lambda i: (0, 0)),    # resident weight
            pl.BlockSpec((1, Cp), lambda i: (0, 0)),    # resident bias
        ],
        out_specs=pl.BlockSpec((tm, Cp), lambda i: (i, 0)),
        compiler_params=pltpu.CompilerParams(
            dimension_semantics=("parallel",),
            vmem_limit_bytes=_VMEM_LIMIT),
    )(x, w, b)


# ------------------------------ Module wrapper ----------------------------- #

class ASPPBlockPallas:
    def __init__(self, in_channels, out_channels, kernel_size, dilation,
                 is_pool, key):
        self.in_channels = in_channels
        self.out_channels = out_channels
        self.dilation = dilation
        self.is_pool = is_pool
        self.k = 1 if is_pool else kernel_size
        self.padding = 0 if (is_pool or kernel_size == 1) else dilation
        self.eps = 1e-5
        self.c_pad = ((out_channels + LANE - 1) // LANE) * LANE

        k0, k1, k2, k3 = jax.random.split(key, 4)
        fan_in = in_channels * self.k * self.k
        bound = 1.0 / (fan_in ** 0.5)
        # PyTorch Conv2d layout (C_out, C_in, kH, kW), uniform(-bound, bound)
        self.w = jax.random.uniform(
            k0, (out_channels, in_channels, self.k, self.k),
            jnp.float32, -bound, bound)
        self.b = jax.random.uniform(
            k1, (out_channels,), jnp.float32, -bound, bound)
        if not is_pool:
            self.gamma = 1.0 + 0.1 * jax.random.normal(k2, (out_channels,),
                                                       jnp.float32)
            self.beta = 0.1 * jax.random.normal(k3, (out_channels,),
                                                jnp.float32)

    # ---- forward ---- #
    def __call__(self, x):
        N, C, H, W = x.shape
        x_nhwc = jnp.transpose(x, (0, 2, 3, 1))
        if self.is_pool:
            out = self._forward_pool(x_nhwc, N, C, H, W)
        else:
            out = self._forward_conv(x_nhwc, N, C, H, W)
        return jnp.transpose(out, (0, 3, 1, 2))  # back to NCHW

    # ---- pool branch: AvgPool2d(2) + 1x1 conv + ReLU ---- #
    def _forward_pool(self, x_nhwc, N, C, H, W):
        Ho, Wo = H // 2, W // 2
        M = N * Ho * Wo
        Cp = self.c_pad
        Kp = 4 * C

        # group 2x2 windows channels-last -> (M, 4*C), window-major then c
        xr = x_nhwc[:, :Ho * 2, :Wo * 2, :].reshape(N, Ho, 2, Wo, 2, C)
        xr = jnp.transpose(xr, (0, 1, 3, 2, 4, 5)).reshape(M, Kp)

        # AvgPool folded into the matmul: replicate weight 4x along K, x 1/4
        wmat = self.w.reshape(self.out_channels, C).T            # (C, C_out)
        wmat = jnp.tile(wmat, (4, 1)) * 0.25                     # (4C, C_out)
        wmat = jnp.pad(wmat, ((0, 0), (0, Cp - self.out_channels)))
        bias = jnp.pad(self.b, (0, Cp - self.out_channels)).reshape(1, Cp)

        tm = _pick_tile_m(M, 8 * (Kp + Cp))
        out = _tiled_matmul_bias_relu(xr, wmat, bias, tm)

        out = out[:, :self.out_channels]
        return out.reshape(N, Ho, Wo, self.out_channels)

    # ---- conv branch: dilated conv + BatchNorm2d (batch stats) + ReLU ---- #
    def _forward_conv(self, x_nhwc, N, C, H, W):
        k, d, p = self.k, self.dilation, self.padding
        eff = d * (k - 1) + 1
        Ho = H + 2 * p - eff + 1
        Wo = W + 2 * p - eff + 1
        M = N * Ho * Wo
        K = k * k * C
        Cp = self.c_pad

        # TODO(synk): im2col below inflates input HBM bytes by k*k; replace
        # with manual-DMA shifted windows (pl.ANY + make_async_copy) at scale.
        xp = jnp.pad(x_nhwc, ((0, 0), (p, p), (p, p), (0, 0)))
        cols = []
        for kh in range(k):
            for kw in range(k):
                cols.append(xp[:, kh * d:kh * d + Ho, kw * d:kw * d + Wo, :])
        patches = jnp.stack(cols, axis=3).reshape(M, K)

        # (C_out, C_in, kH, kW) -> (kH, kW, C_in, C_out) -> (K, C_pad) lane-dense
        wmat = jnp.transpose(self.w, (2, 3, 1, 0)).reshape(K, self.out_channels)
        wmat = jnp.pad(wmat, ((0, 0), (0, Cp - self.out_channels)))

        tm = _pick_tile_m(M, 8 * (K + Cp))
        nt = M // tm

        # ---- pass 1: per-tile partial BN stats (no y writeback) ---- #
        sums, sqs = pl.pallas_call(
            _matmul_stats_kernel,
            out_shape=(
                jax.ShapeDtypeStruct((nt, 1, Cp), jnp.float32),
                jax.ShapeDtypeStruct((nt, 1, Cp), jnp.float32),
            ),
            grid=(nt,),
            in_specs=[
                pl.BlockSpec((tm, K), lambda i: (i, 0)),
                pl.BlockSpec((K, Cp), lambda i: (0, 0)),    # resident weight
            ],
            out_specs=(
                pl.BlockSpec((1, 1, Cp), lambda i: (i, 0, 0)),
                pl.BlockSpec((1, 1, Cp), lambda i: (i, 0, 0)),
            ),
            compiler_params=pltpu.CompilerParams(
                dimension_semantics=("parallel",),
                vmem_limit_bytes=_VMEM_LIMIT),
        )(patches, wmat)

        # ---- tiny per-channel finalize (O(C) work): fold BN into W/b ---- #
        # y = m + b_conv ; mean_y = mean_m + b_conv ; var_y = var_m, so the
        # conv bias cancels and  out = m*scale + (beta - scale*mean_m).
        mean_m = jnp.sum(sums[:, 0, :], axis=0) / M
        ex2 = jnp.sum(sqs[:, 0, :], axis=0) / M
        var = jnp.maximum(ex2 - mean_m * mean_m, 0.0)   # guard f32 cancellation
        gamma = jnp.pad(self.gamma, (0, Cp - self.out_channels))
        beta = jnp.pad(self.beta, (0, Cp - self.out_channels))
        scale = gamma * lax.rsqrt(var + self.eps)
        w_eff = wmat * scale[None, :]                    # (K, Cp)
        b_eff = (beta - scale * mean_m).reshape(1, Cp)   # (1, Cp)

        # ---- pass 2: fused conv-matmul + BN + ReLU (shared kernel) ---- #
        out = _tiled_matmul_bias_relu(patches, w_eff, b_eff, tm)

        out = out[:, :self.out_channels]
        return out.reshape(N, Ho, Wo, self.out_channels)


# ------------------------------ pure-JAX reference ------------------------- #

def ref_forward(block, x):
    N, C, H, W = x.shape
    dn = ("NCHW", "OIHW", "NCHW")
    if block.is_pool:
        xp = x[:, :, :(H // 2) * 2, :(W // 2) * 2]
        xp = xp.reshape(N, C, H // 2, 2, W // 2, 2).mean(axis=(3, 5))
        y = lax.conv_general_dilated(xp, block.w, (1, 1), "VALID",
                                     dimension_numbers=dn)
        y = y + block.b[None, :, None, None]
        return jnp.maximum(y, 0.0)
    p, d = block.padding, block.dilation
    y = lax.conv_general_dilated(x, block.w, (1, 1), [(p, p), (p, p)],
                                 rhs_dilation=(d, d), dimension_numbers=dn)
    y = y + block.b[None, :, None, None]
    mean = jnp.mean(y, axis=(0, 2, 3), keepdims=True)
    var = jnp.mean((y - mean) ** 2, axis=(0, 2, 3), keepdims=True)
    y = (y - mean) / jnp.sqrt(var + block.eps)
    y = y * block.gamma[None, :, None, None] + block.beta[None, :, None, None]
    return jnp.maximum(y, 0.0)


# ----------------------------------- main ----------------------------------- #

if __name__ == "__main__":
    key = jax.random.PRNGKey(0)
    kx, kp1, kp2 = jax.random.split(key, 3)

    N, C_in, H, W = 2, 4, 16, 16
    C_out = 8
    x = jax.random.normal(kx, (N, C_in, H, W), jnp.float32)

    # non-pool branch: dilated 3x3 conv + BN + ReLU
    blk_conv = ASPPBlockPallas(C_in, C_out, kernel_size=3, dilation=2,
                               is_pool=False, key=kp1)
    out_conv = jax.block_until_ready(blk_conv(x))
    ref_conv = ref_forward(blk_conv, x)
    assert out_conv.shape == ref_conv.shape
    assert jnp.allclose(out_conv, ref_conv, atol=1e-4, rtol=1e-4), (
        float(jnp.max(jnp.abs(out_conv - ref_conv))))

    # pool branch: AvgPool2d(2) + 1x1 conv + ReLU
    blk_pool = ASPPBlockPallas(C_in, C_out, kernel_size=1, dilation=1,
                               is_pool=True, key=kp2)
    out_pool = jax.block_until_ready(blk_pool(x))
    ref_pool = ref_forward(blk_pool, x)
    assert out_pool.shape == ref_pool.shape
    assert jnp.allclose(out_pool, ref_pool, atol=1e-4, rtol=1e-4), (
        float(jnp.max(jnp.abs(out_pool - ref_pool))))

    print("KERNEL_OK")
</pallas_src>

<mosaic_0001>
module attributes {stable_mosaic.version = 11 : i64} {
  func.func @_matmul_stats_kernel(%arg0: i32, %arg1: memref<256x36xf32, #tpu.memory_space<vmem>>, %arg2: memref<36x128xf32, #tpu.memory_space<vmem>>, %arg3: memref<1x1x128xf32, #tpu.memory_space<vmem>>, %arg4: memref<1x1x128xf32, #tpu.memory_space<vmem>>) attributes {dimension_semantics = [#tpu.dimension_semantics<parallel>], iteration_bounds = array<i64: 2>, scalar_prefetch = 0 : i64, scratch_operands = 0 : i64, tpu.core_type = #tpu.core_type<tc>, window_params = [{transform_indices = @transform_0, window_bounds = array<i64: 256, 36>}, {pipeline_mode = #tpu.pipeline_mode<synchronous>, transform_indices = @transform_1, window_bounds = array<i64: 36, 128>}, {transform_indices = @transform_2, window_bounds = array<i64: 1, 1, 128>}, {transform_indices = @transform_3, window_bounds = array<i64: 1, 1, 128>}]} {
    %c0 = arith.constant 0 : index
    %c0_0 = arith.constant 0 : index
    %0 = vector.load %arg1[%c0, %c0_0] : memref<256x36xf32, #tpu.memory_space<vmem>>, vector<256x36xf32>
    %c0_1 = arith.constant 0 : index
    %c0_2 = arith.constant 0 : index
    %1 = vector.load %arg2[%c0_1, %c0_2] : memref<36x128xf32, #tpu.memory_space<vmem>>, vector<36x128xf32>
    %cst = arith.constant dense<0.000000e+00> : vector<256x128xf32>
    %2 = tpu.matmul %0, %1, %cst {dimension_numbers = #tpu.dot_dimension_numbers<[1], [0], [0], [1], [0, 0, 1, 1], [], []>} : vector<256x36xf32>, vector<36x128xf32>, vector<256x128xf32> -> vector<256x128xf32>
    %cst_3 = arith.constant dense<0.000000e+00> : vector<128xf32>
    %3 = vector.multi_reduction <add>, %2, %cst_3 [0] : vector<256x128xf32> to vector<128xf32>
    %4 = vector.shape_cast %3 : vector<128xf32> to vector<1x128xf32>
    %5 = vector.shape_cast %4 : vector<1x128xf32> to vector<1x1x128xf32>
    %c0_4 = arith.constant 0 : index
    %c0_5 = arith.constant 0 : index
    %c0_6 = arith.constant 0 : index
    %6 = vector.load %arg3[%c0_4, %c0_5, %c0_6] : memref<1x1x128xf32, #tpu.memory_space<vmem>>, vector<1x1x128xf32>
    tpu.vector_store %arg3[%c0_4, %c0_5, %c0_6], %5 {strides = array<i32>} : memref<1x1x128xf32, #tpu.memory_space<vmem>>, vector<1x1x128xf32>,
    %7 = arith.mulf %2, %2 : vector<256x128xf32>
    %cst_7 = arith.constant dense<0.000000e+00> : vector<128xf32>
    %8 = vector.multi_reduction <add>, %7, %cst_7 [0] : vector<256x128xf32> to vector<128xf32>
    %9 = vector.shape_cast %8 : vector<128xf32> to vector<1x128xf32>
    %10 = vector.shape_cast %9 : vector<1x128xf32> to vector<1x1x128xf32>
    %c0_8 = arith.constant 0 : index
    %c0_9 = arith.constant 0 : index
    %c0_10 = arith.constant 0 : index
    %11 = vector.load %arg4[%c0_8, %c0_9, %c0_10] : memref<1x1x128xf32, #tpu.memory_space<vmem>>, vector<1x1x128xf32>
    tpu.vector_store %arg4[%c0_8, %c0_9, %c0_10], %10 {strides = array<i32>} : memref<1x1x128xf32, #tpu.memory_space<vmem>>, vector<1x1x128xf32>,
    return
  }
  func.func @transform_0(%arg0: i32) -> (i32, i32) {
    %c0_i32 = arith.constant 0 : i32
    %c0_i32_0 = arith.constant 0 : i32
    return %arg0, %c0_i32 : i32, i32
  }
  func.func @transform_1(%arg0: i32) -> (i32, i32) {
    %c0_i32 = arith.constant 0 : i32
    %c0_i32_0 = arith.constant 0 : i32
    %c0_i32_1 = arith.constant 0 : i32
    return %c0_i32, %c0_i32_0 : i32, i32
  }
  func.func @transform_2(%arg0: i32) -> (i32, i32, i32) {
    %c0_i32 = arith.constant 0 : i32
    %c0_i32_0 = arith.constant 0 : i32
    %c0_i32_1 = arith.constant 0 : i32
    return %arg0, %c0_i32, %c0_i32_0 : i32, i32, i32
  }
  func.func @transform_3(%arg0: i32) -> (i32, i32, i32) {
    %c0_i32 = arith.constant 0 : i32
    %c0_i32_0 = arith.constant 0 : i32
    %c0_i32_1 = arith.constant 0 : i32
    return %arg0, %c0_i32, %c0_i32_0 : i32, i32, i32
  }
}

</mosaic_0001>

<bundles_post_ra>
// kernel: tpu_custom_call.1
= control target key start
LH: loop header
LB: loop body
LE: loop exit
PB: predicated region body
PF: predicated region fallthrough
CT: control target
= control target key end

     0   :  { %9 = vsyncpa [#allocation3], 0  ;;  %s1341_s0 = inlined_call_operand.vmem [shape: f32[512,36], index: 0, kind: input, shape index: {}]   ;;  %s1342_s1 = inlined_call_operand.vmem [shape: f32[36,128], index: 1, kind: input, shape index: {}]   ;;  %s1343_s2 = inlined_call_operand.hbm [shape: f32[2,1,128], index: 2, kind: output, shape index: {0}]   ;;  %s1344_s3 = inlined_call_operand.hbm [shape: f32[2,1,128], index: 3, kind: output, shape index: {1}]  }
   0x1   :  { %11 = vsyncpa [#allocation3 + $0x1], 0 }
   0x2   :  { %12 = vsyncpa [#allocation5], 0 }
   0x3   :  { %14 = vsyncpa [#allocation5 + $0x1], 0  ;;  %s1078_s12 = smov 0   ;;  %s1080_s13 = smov 0  }
   0x4   :  { %s1082_s14 = smov 0   ;;  %s1084_s15 = smov 0  }
   0x5 LB: > { %s1099_s16 = sadd.s32 4294967295, %s1054_s15   ;;  %s764_s17 = sadd.s32 4294967294, %s1054_s15   ;;  %s1054_s15 = sphi %s1084_s15, %s1350_s15   ;;  %s1050_s14 = sphi %s1082_s14, %s1349_s14   ;;  %s1046_s13 = sphi %s1080_s13, %s1348_s13   ;;  %s1042_s12 = sphi %s1078_s12, %s1347_s12  }
   0x6   : > { %s1103_s18 = sadd.s32 1, %s1054_s15   ;;  %s74_s19 = sadd.s32 1, %s1050_s14 }
   0x7   : > { %s71_s20 = ssub.s32 %s1054_s15, %s1103_s18  ;;  %p84_p0 = scmp.ne.s32.totalorder %s1050_s14, %s1046_s13 }
   0x8   : > { %p72_p1 = scmp.eq.s32.totalorder %s71_s20, 0  ;;  %p85_p2 = scmp.eq.s32.totalorder %s1099_s16, 1 }
   0x9   : > { %p90_p3 = scmp.ne.s32.totalorder %s1046_s13, %s1042_s12  ;;  %p91_p4 = scmp.eq.s32.totalorder %s764_s17, 1 }
   0xa   : > { %s1114_s21 = scalar_select %p72_p1, %s1050_s14, %s74_s19  }
   0xb   : > { %p1116_p5 = por %p85_p2, %p84_p0  ;;  %p1120_p6 = por %p91_p4, %p90_p3 }
   0xc   : > { %p767_p7 = scmp.ge.s32.totalorder %s1054_s15, 1  ;;  %p147_p8 = scmp.lt.s32.totalorder %s1054_s15, 3 }
   0xe   : > { %p148_p9 = pnand %p767_p7, %p147_p8 }
   0xf   : > { %v212_v0 = vld [vmem:[%s1342_s1] sm:$0xff] (!%p148_p9)  ;;  %v213_v1 = vld [vmem:[%s1342_s1 + $0x8] sm:$0xff] (!%p148_p9)  ;;  %v214_v2 = vld [vmem:[%s1342_s1 + $0x10] sm:$0xff] (!%p148_p9)  ;;  %s768_s30 = sshll.u32 (!%p148_p9), %s1099_s16, 5  ;;  %vm217_vm0 = vcmask (!%p148_p9), 293888   ;;  %vm314_vm1 = vcmask (!%p148_p9), 1043456  }
  0x10   : > { %151 = sbr.rel (%p148_p9) target bundleno = 354 (0x162), region = 28  ;;  %v902_v3 = vpack.c.bf16 (!%p148_p9), %v213_v1, %v212_v0  ;;  %v215_v4 = vld [vmem:[%s1342_s1 + $0x18] sm:$0xff] (!%p148_p9)  ;;  %p175_p10 = scmp.lt.s32.totalorder (!%p148_p9), %s768_s30, 63  ;;  %v216_v6 = vld [vmem:[%s1342_s1 + $0x20] sm:$0xf] (!%p148_p9) }
  0x11   : > { %v906_v5 = vpack.c.bf16 (!%p148_p9), %v215_v4, %v214_v2  ;;  %s1257_s17 = sand.u32 (!%p148_p9), 1, %s1046_s13   ;;  %s803_s19 = sshll.u32 (!%p148_p9), %s1099_s16, 4 }
  0x12   : > { %903 = vmatprep.subr.bf16.mxu0 (!%p148_p9), %v902_v3  ;;  %910 = vmatprep.subr.bf16.mxu1 (!%p148_p9), %v902_v3  ;;  %s167_s20 = scalar_lea.vmem (!%p148_p9), [#allocation2], %s1257_s17  ;;  %s173_s25 = scalar_lea.vmem (!%p148_p9), [#allocation4], %s1257_s17 }
  0x13   : > { %905 = vmatpush3.bf16.msra.mxu0 (!%p148_p9), %v902_v3  ;;  %913 = vmatpush3.bf16.msra.mxu1 (!%p148_p9), %v902_v3  ;;  %s668_s24 = sshll.u32 (!%p148_p9), %s167_s20, 4  ;;  %s681_s26 = sshll.u32 (!%p148_p9), %s173_s25, 4  ;;  %s1269_s24 = int_to_ptr.vmem [resolvable:$true] %s668_s24  ;;  %s1276_s26 = int_to_ptr.vmem [resolvable:$true] %s681_s26 }
  0x14   : > { %907 = vmatprep.subr.bf16.mxu0 (!%p148_p9), %v906_v5  ;;  %911 = vmatprep.subr.bf16.mxu1 (!%p148_p9), %v906_v5  ;;  %s1267_s29 = scalar_lea.hbm (!%p148_p9), %s1343_s2, %s803_s19  ;;  %s1274_s4 = scalar_lea.hbm (!%p148_p9), %s1344_s3, %s803_s19 }
  0x15   : > { %s652_s5 = scalar_lea.sflag (!%p148_p9), [#allocation3], %s1257_s17  ;;  %s1056_s7 = smov (!%p148_p9), [#allocation2]  }
  0x16   : > { %s964_s8 = sshll.u32 (!%p148_p9), %s1056_s7, 4  ;;  %s965_s8 = int_to_ptr.vmem [resolvable:$false] %s964_s8 }
  0x17   : > { %s1352_s30 = smov (!%p175_p10, %s768_s30), 63  ;;  %909 = vmatpush3.bf16.msra.mxu0 %v906_v5  ;;  %914 = vmatpush3.bf16.msra.mxu1 %v906_v5  ;;  %s966_s9 = scalar_lea.vmem %s965_s8, 32 }
  0x18   : > { %s769_s6 = sshll.u32 %s1352_s30, 3  ;;  %852 = vmatprep.subr.msk.mxu0 %vm314_vm1, %v216_v6  ;;  %912 = vmatprep.subr.msk.mxu1 %vm314_vm1, %v216_v6  ;;  %p967_p0 = scmp.lt.s32.totalorder %s1269_s24, %s965_s8 }
  0x19   : > { %s1145_s11 = scalar_lea.vmem %s1341_s0, %s769_s6  ;;  %s960_s6 = scalar_lea.vmem %s1269_s24, 16 }
  0x1a   : > { %v180_v7 = vld [vmem:[%s1145_s11] sm:$0xff]  ;;  %v181_v8 = vld [vmem:[%s1145_s11 + $0x8] sm:$0xff]  ;;  %v182_v9 = vld [vmem:[%s1145_s11 + $0x10] sm:$0xff]  ;;  %p961_p11 = scmp.ne.s32.totalorder %s1269_s24, %s960_s6  ;;  %p968_p1 = scmp.lt.s32.totalorder %s966_s9, %s960_s6 }
  0x1b   : > { %854 = vmatprep.mubr.msk.f32.mxu0 %vm217_vm0, %v180_v7  ;;  %853 = vmatpush3.msk.msra.mxu0 %vm314_vm1, %v216_v6  ;;  %v196_v10 = vld [vmem:[%s1145_s11 + $0x80] sm:$0xff]  ;;  %v197_v11 = vld [vmem:[%s1145_s11 + $0x88] sm:$0xff]  ;;  %v198_v12 = vld [vmem:[%s1145_s11 + $0x90] sm:$0xff] }
  0x1c   : > { %855 = vmatmul.mubr.msk.f32.vlgmr.msra.gmra.mrb[0].mxu0 %vm217_vm0, %v181_v8  ;;  %915 = vmatpush3.msk.msra.mxu1 %vm314_vm1, %v216_v6  ;;  %v183_v13 = vld [vmem:[%s1145_s11 + $0x18] sm:$0xff]  ;;  %v184_v14 = vld [vmem:[%s1145_s11 + $0x20] sm:$0xff]  ;;  %v185_v17 = vld [vmem:[%s1145_s11 + $0x28] sm:$0xff]  ;;  %p962_p12 = pnand %p961_p11, %p1116_p5  ;;  %p969_p2 = por %p968_p1, %p967_p0 }
  0x1d   : > { %857 = vmatprep.mubr.msk.f32.mxu0 %vm217_vm0, %v182_v9  ;;  %878 = vmatprep.mubr.msk.f32.mxu1 %vm217_vm0, %v196_v10  ;;  %v199_v15 = vld [vmem:[%s1145_s11 + $0x98] sm:$0xff]  ;;  %v200_v16 = vld [vmem:[%s1145_s11 + $0xa0] sm:$0xff]  ;;  %v186_v18 = vld [vmem:[%s1145_s11 + $0x30] sm:$0xff] }
  0x1e   : > { %879 = vmatmul.mubr.msk.f32.vlgmr.msra.gmra.mrb[0].mxu1 %vm217_vm0, %v197_v11  ;;  %v201_v19 = vld [vmem:[%s1145_s11 + $0xa8] sm:$0xff]  ;;  %v202_v20 = vld [vmem:[%s1145_s11 + $0xb0] sm:$0xff]  ;;  %v187_v21 = vld [vmem:[%s1145_s11 + $0x38] sm:$0xff]  ;;  %p963_p13 = pneg %p962_p12 }
  0x1f   : > { %881 = vmatprep.mubr.msk.f32.mxu1 %vm217_vm0, %v198_v12  ;;  %v188_v22 = vld [vmem:[%s1145_s11 + $0x40] sm:$0xff]  ;;  %v203_v23 = vld [vmem:[%s1145_s11 + $0xb8] sm:$0xff]  ;;  %v189_v25 = vld [vmem:[%s1145_s11 + $0x48] sm:$0xff] }
  0x20   : > { %858 = vmatmul.mubr.msk.f32.gmra.mrb[2].mxu0 %vm217_vm0, %v183_v13  ;;  %v204_v24 = vld [vmem:[%s1145_s11 + $0xc0] sm:$0xff]  ;;  %v190_v26 = vld [vmem:[%s1145_s11 + $0x50] sm:$0xff]  ;;  %v205_v27 = vld [vmem:[%s1145_s11 + $0xc8] sm:$0xff]  ;;  %p970_p3 = pnand %p969_p2, %p963_p13 }
  0x21   : > { %860 = vmatprep.mubr.msk.f32.mxu0 %vm217_vm0, %v184_v14  ;;  %v206_v28 = vld [vmem:[%s1145_s11 + $0xd0] sm:$0xff]  ;;  %v191_v29 = vld [vmem:[%s1145_s11 + $0x58] sm:$0xff]  ;;  %v192_v30 = vld [vmem:[%s1145_s11 + $0x60] sm:$0xff] }
  0x22   : > { %882 = vmatmul.mubr.msk.f32.gmra.mrb[2].mxu1 %vm217_vm0, %v199_v15  ;;  %v207_v31 = vld [vmem:[%s1145_s11 + $0xd8] sm:$0xff]  ;;  %v208_v32 = vld [vmem:[%s1145_s11 + $0xe0] sm:$0xff]  ;;  %v193_v33 = vld [vmem:[%s1145_s11 + $0x68] sm:$0xff] }
  0x23   : > { %884 = vmatprep.mubr.msk.f32.mxu1 %vm217_vm0, %v200_v16  ;;  %v194_v34 = vld [vmem:[%s1145_s11 + $0x70] sm:$0xff]  ;;  %v209_v35 = vld [vmem:[%s1145_s11 + $0xe8] sm:$0xff]  ;;  %v195_v37 = vld [vmem:[%s1145_s11 + $0x78] sm:$0xff] }
  0x24   : > { %861 = vmatmul.mubr.msk.f32.gmra.mrb[4].mxu0 %vm217_vm0, %v185_v17  ;;  %v210_v36 = vld [vmem:[%s1145_s11 + $0xf0] sm:$0xff]  ;;  %v211_v38 = vld [vmem:[%s1145_s11 + $0xf8] sm:$0xff] }
  0x25   : > { %863 = vmatprep.mubr.msk.f32.mxu0 %vm217_vm0, %v186_v18 }
  0x26   : > { %885 = vmatmul.mubr.msk.f32.gmra.mrb[4].mxu1 %vm217_vm0, %v201_v19 }
  0x27   : > { %887 = vmatprep.mubr.msk.f32.mxu1 %vm217_vm0, %v202_v20 }
  0x28   : > { %864 = vmatmul.mubr.msk.f32.gmra.mrb[6].mxu0 %vm217_vm0, %v187_v21 }
  0x29   : > { %866 = vmatprep.mubr.msk.f32.mxu0 %vm217_vm0, %v188_v22 }
  0x2a   : > { %888 = vmatmul.mubr.msk.f32.gmra.mrb[6].mxu1 %vm217_vm0, %v203_v23 }
  0x2b   : > { %890 = vmatprep.mubr.msk.f32.mxu1 %vm217_vm0, %v204_v24 }
  0x2c   : > { %867 = vmatmul.mubr.msk.f32.gmra.mrb[8].mxu0 %vm217_vm0, %v189_v25 }
  0x2d   : > { %869 = vmatprep.mubr.msk.f32.mxu0 %vm217_vm0, %v190_v26 }
  0x2e   : > { %891 = vmatmul.mubr.msk.f32.gmra.mrb[8].mxu1 %vm217_vm0, %v205_v27 }
  0x2f   : > { %893 = vmatprep.mubr.msk.f32.mxu1 %vm217_vm0, %v206_v28 }
  0x30   : > { %870 = vmatmul.mubr.msk.f32.gmra.mrb[10].mxu0 %vm217_vm0, %v191_v29 }
  0x31   : > { %872 = vmatprep.mubr.msk.f32.mxu0 %vm217_vm0, %v192_v30 }
  0x32   : > { %894 = vmatmul.mubr.msk.f32.gmra.mrb[10].mxu1 %vm217_vm0, %v207_v31 }
  0x33   : > { %896 = vmatprep.mubr.msk.f32.mxu1 %vm217_vm0, %v208_v32 }
  0x34   : > { %873 = vmatmul.mubr.msk.f32.gmra.mrb[12].mxu0 %vm217_vm0, %v193_v33 }
  0x35   : > { %875 = vmatprep.mubr.msk.f32.mxu0 %vm217_vm0, %v194_v34 }
  0x36   : > { %897 = vmatmul.mubr.msk.f32.gmra.mrb[12].mxu1 %vm217_vm0, %v209_v35 }
  0x37   : > { %899 = vmatprep.mubr.msk.f32.mxu1 %vm217_vm0, %v210_v36 }
  0x38   : > { %876 = vmatmul.mubr.msk.f32.gmra.mrb[14].mxu0 %vm217_vm0, %v195_v37 }
  0x3a   : > { %900 = vmatmul.mubr.msk.f32.gmra.mrb[14].mxu1 %vm217_vm0, %v211_v38 }
  0xef   : > { %v856_v39 = vpop.f32.mrb[0].mxu0 }
  0xf0   : > { %v582_v40 = vmul.f32 %v856_v39, %v856_v39  ;;  %v384_v41 = vpop.f32.mrb[1].mxu0 }
  0xf1   : > { %v543_v42 = vadd.f32 %v856_v39, %v384_v41  ;;  %v581_v43 = vmul.f32 %v384_v41, %v384_v41  ;;  %v1211_v44 = vpop.f32.mrb[0].mxu1 }
  0xf2   : > { %v1213_v45 = vpop.f32.mrb[1].mxu1 }
  0xf3   : > { %v613_v46 = vadd.f32 %v582_v40, %v581_v43  ;;  %v859_v47 = vpop.f32.mrb[2].mxu0 }
  0xf4   : > { %v394_v48 = vpop.f32.mrb[3].mxu0  ;;  %v584_v53 = vmul.f32 %v859_v47, %v859_v47 }
  0xf5   : > { %v544_v49 = vadd.f32 %v543_v42, %v394_v48  ;;  %v583_v50 = vmul.f32 %v394_v48, %v394_v48  ;;  %v1215_v51 = vpop.f32.mrb[2].mxu1 }
  0xf6   : > { %v1217_v52 = vpop.f32.mrb[3].mxu1 }
  0xf7   : > { %v614_v54 = vadd.f32 %v613_v46, %v583_v50  ;;  %v862_v55 = vpop.f32.mrb[4].mxu0  ;;  %v545_v56 = vadd.f32 %v859_v47, %v544_v49 }
  0xf8   : > { %v404_v57 = vpop.f32.mrb[5].mxu0  ;;  %v586_v63 = vmul.f32 %v862_v55, %v862_v55 }
  0xf9   : > { %v546_v58 = vadd.f32 %v545_v56, %v404_v57  ;;  %v585_v59 = vmul.f32 %v404_v57, %v404_v57  ;;  %v615_v60 = vadd.f32 %v614_v54, %v584_v53  ;;  %v1219_v61 = vpop.f32.mrb[4].mxu1  ;;  %v597_v56 = vmul.f32 %v1213_v45, %v1213_v45 }
  0xfa   : > { %v1221_v62 = vpop.f32.mrb[5].mxu1 }
  0xfb   : > { %v616_v0 = vadd.f32 %v615_v60, %v585_v59  ;;  %v865_v1 = vpop.f32.mrb[6].mxu0  ;;  %v547_v2 = vadd.f32 %v862_v55, %v546_v58  ;;  %v598_v59 = vmul.f32 %v1211_v44, %v1211_v44 }
  0xfc   : > { %v414_v3 = vpop.f32.mrb[7].mxu0  ;;  %v588_v9 = vmul.f32 %v865_v1, %v865_v1 }
  0xfd   : > { %v548_v4 = vadd.f32 %v547_v2, %v414_v3  ;;  %v587_v5 = vmul.f32 %v414_v3, %v414_v3  ;;  %v617_v6 = vadd.f32 %v616_v0, %v586_v63  ;;  %v1223_v7 = vpop.f32.mrb[6].mxu1  ;;  %v599_v0 = vmul.f32 %v1217_v52, %v1217_v52 }
  0xfe   : > { %v1225_v8 = vpop.f32.mrb[7].mxu1  ;;  %v600_v3 = vmul.f32 %v1215_v51, %v1215_v51 }
  0xff   : > { %v618_v10 = vadd.f32 %v617_v6, %v587_v5  ;;  %v868_v11 = vpop.f32.mrb[8].mxu0  ;;  %v549_v12 = vadd.f32 %v865_v1, %v548_v4 }
 0x100   : > { %v424_v13 = vpop.f32.mrb[9].mxu0  ;;  %v590_v19 = vmul.f32 %v868_v11, %v868_v11 }
 0x101   : > { %v550_v14 = vadd.f32 %v549_v12, %v424_v13  ;;  %v589_v15 = vmul.f32 %v424_v13, %v424_v13  ;;  %v619_v16 = vadd.f32 %v618_v10, %v588_v9  ;;  %v1227_v17 = vpop.f32.mrb[8].mxu1 }
 0x102   : > { %v504_v18 = vpop.f32.mrb[9].mxu1 }
 0x103   : > { %v620_v20 = vadd.f32 %v619_v16, %v589_v15  ;;  %v871_v21 = vpop.f32.mrb[10].mxu0  ;;  %v551_v22 = vadd.f32 %v868_v11, %v550_v14 }
 0x104   : > { %v434_v23 = vpop.f32.mrb[11].mxu0  ;;  %v592_v29 = vmul.f32 %v871_v21, %v871_v21 }
 0x105   : > { %v552_v24 = vadd.f32 %v551_v22, %v434_v23  ;;  %v591_v25 = vmul.f32 %v434_v23, %v434_v23  ;;  %v621_v26 = vadd.f32 %v620_v20, %v590_v19  ;;  %v895_v27 = vpop.f32.mrb[10].mxu1  ;;  %v606_v20 = vmul.f32 %v1227_v17, %v1227_v17 }
 0x106   : > { %v514_v28 = vpop.f32.mrb[11].mxu1 }
 0x107   : > { %v622_v30 = vadd.f32 %v621_v26, %v591_v25  ;;  %v874_v31 = vpop.f32.mrb[12].mxu0  ;;  %v553_v32 = vadd.f32 %v871_v21, %v552_v24  ;;  %v607_v22 = vmul.f32 %v514_v28, %v514_v28 }
 0x108   : > { %v444_v33 = vpop.f32.mrb[13].mxu0  ;;  %v594_v39 = vmul.f32 %v874_v31, %v874_v31 }
 0x109   : > { %v554_v34 = vadd.f32 %v553_v32, %v444_v33  ;;  %v593_v35 = vmul.f32 %v444_v33, %v444_v33  ;;  %v623_v36 = vadd.f32 %v622_v30, %v592_v29  ;;  %v898_v37 = vpop.f32.mrb[12].mxu1 }
 0x10a   : > { %v524_v38 = vpop.f32.mrb[13].mxu1 }
 0x10b   : > { %v624_v40 = vadd.f32 %v623_v36, %v593_v35  ;;  %v877_v41 = vpop.f32.mrb[14].mxu0  ;;  %v555_v42 = vadd.f32 %v874_v31, %v554_v34  ;;  %v609_v29 = vmul.f32 %v524_v38, %v524_v38 }
 0x10c   : > { %v454_v43 = vpop.f32.mrb[15].mxu0  ;;  %v596_v53 = vmul.f32 %v877_v41, %v877_v41 }
 0x10d   : > { %v556_v46 = vadd.f32 %v555_v42, %v454_v43  ;;  %v595_v47 = vmul.f32 %v454_v43, %v454_v43  ;;  %v625_v48 = vadd.f32 %v624_v40, %v594_v39  ;;  %v901_v49 = vpop.f32.mrb[14].mxu1 }
 0x10e   : > { %v534_v50 = vpop.f32.mrb[15].mxu1  ;;  %v612_v36 = vmul.f32 %v901_v49, %v901_v49 }
 0x10f   : > { %v557_v54 = vadd.f32 %v877_v41, %v556_v46  ;;  %v626_v55 = vadd.f32 %v625_v48, %v595_v47  ;;  %v611_v33 = vmul.f32 %v534_v50, %v534_v50 }
 0x111   : > { %v627_v57 = vadd.f32 %v626_v55, %v596_v53  ;;  %v558_v58 = vadd.f32 %v557_v54, %v1213_v45  ;;  %v601_v45 = vmul.f32 %v1221_v62, %v1221_v62 }
 0x113   : > { %v628_v60 = vadd.f32 %v627_v57, %v597_v56  ;;  %v559_v63 = vadd.f32 %v1211_v44, %v558_v58  ;;  %v602_v44 = vmul.f32 %v1219_v61, %v1219_v61 }
 0x115   : > { %v560_v1 = vadd.f32 %v559_v63, %v1217_v52  ;;  %v629_v2 = vadd.f32 %v628_v60, %v598_v59  ;;  %v603_v52 = vmul.f32 %v1225_v8, %v1225_v8 }
 0x117   : > { %v630_v4 = vadd.f32 %v629_v2, %v599_v0  ;;  %v561_v5 = vadd.f32 %v1215_v51, %v560_v1  ;;  %v604_v51 = vmul.f32 %v1223_v7, %v1223_v7 }
 0x119   : > { %v562_v6 = vadd.f32 %v561_v5, %v1221_v62  ;;  %v631_v9 = vadd.f32 %v630_v4, %v600_v3  ;;  %v605_v62 = vmul.f32 %v504_v18, %v504_v18 }
 0x11b   : > { %v632_v10 = vadd.f32 %v631_v9, %v601_v45  ;;  %v563_v11 = vadd.f32 %v1219_v61, %v562_v6 }
 0x11d   : > { %v564_v12 = vadd.f32 %v563_v11, %v1225_v8  ;;  %v633_v13 = vadd.f32 %v632_v10, %v602_v44  ;;  %v608_v8 = vmul.f32 %v895_v27, %v895_v27 }
 0x11f   : > { %v634_v14 = vadd.f32 %v633_v13, %v603_v52  ;;  %v565_v15 = vadd.f32 %v1223_v7, %v564_v12  ;;  %v610_v7 = vmul.f32 %v898_v37, %v898_v37 }
 0x121   : > { %v566_v16 = vadd.f32 %v565_v15, %v504_v18  ;;  %v635_v19 = vadd.f32 %v634_v14, %v604_v51 }
 0x123   : > { %v636_v21 = vadd.f32 %v635_v19, %v605_v62  ;;  %v567_v61 = vadd.f32 %v1227_v17, %v566_v16 }
 0x125   : > { %v568_v23 = vadd.f32 %v567_v61, %v514_v28  ;;  %v637_v24 = vadd.f32 %v636_v21, %v606_v20 }
 0x127   : > { %v638_v25 = vadd.f32 %v637_v24, %v607_v22  ;;  %v569_v26 = vadd.f32 %v895_v27, %v568_v23 }
 0x129   : > { %v570_v30 = vadd.f32 %v569_v26, %v524_v38  ;;  %v639_v31 = vadd.f32 %v638_v25, %v608_v8 }
 0x12b   : > { %v640_v32 = vadd.f32 %v639_v31, %v609_v29  ;;  %v571_v18 = vadd.f32 %v898_v37, %v570_v30 }
 0x12d   : > { %v572_v34 = vadd.f32 %v571_v18, %v534_v50  ;;  %v641_v35 = vadd.f32 %v640_v32, %v610_v7 }
 0x12f   : > { %v573_v39 = vadd.f32 %v901_v49, %v572_v34  ;;  %v642_v17 = vadd.f32 %v641_v35, %v611_v33 }
 0x131   : > { %v574_v40 = vrot.slane %v573_v39, 4  ;;  %v643_v28 = vadd.f32 %v642_v17, %v612_v36 }
 0x133   : > { %v575_v27 = vadd.f32 %v574_v40, %v573_v39  ;;  %v644_v38 = vrot.slane %v643_v28, 4 }
 0x135   : > { %v576_v41 = vrot.slane %v575_v27, 2  ;;  %v645_v42 = vadd.f32 %v644_v38, %v643_v28 }
 0x137   : > { %v577_v43 = vadd.f32 %v576_v41, %v575_v27  ;;  %v646_v37 = vrot.slane %v645_v42, 2 }
 0x139   : > { %v578_v46 = vrot.slane %v577_v43, 1  ;;  %v647_v47 = vadd.f32 %v646_v37, %v645_v42 }
 0x13b   : > { %v579_v48 = vadd.f32 %v578_v46, %v577_v43  ;;  %v648_v49 = vrot.slane %v647_v47, 1 }
 0x13d   : > { %580 = vst [vmem:[%s167_s20] sm:$0x1] %v579_v48  ;;  %v649_v50 = vadd.f32 %v648_v49, %v647_v47 }
 0x13e   : > { %973 = shalt.err (!%p970_p3)
}
 0x13f   : > { %s974_s10 = scalar_lea.hbm %s1267_s29, 16  ;;  %s978_s20 = scalar_lea.hbm %s1343_s2, 32 }
 0x140   : > { %p975_p4 = scmp.ne.s32.totalorder %s1267_s29, %s974_s10  ;;  %p979_p9 = scmp.lt.u32.totalorder %s1267_s29, %s1343_s2 }
 0x141   : > { %p980_p10 = scmp.lt.u32.totalorder %s978_s20, %s974_s10  ;;  %p982_p12 = scmp.lt.u32.totalorder %s974_s10, %s1267_s29 }
 0x142   : > { %p976_p7 = pnand %p975_p4, %p1116_p5 }
 0x143   : > { %p981_p11 = por %p980_p10, %p979_p9 }
 0x144   : > { %p977_p8 = pneg %p976_p7 }
 0x145   : > { %p983_p13 = por %p982_p12, %p981_p11 }
 0x147   : > { %p984_p0 = pnand %p983_p13, %p977_p8 }
 0x149   : > { %987 = shalt.err (!%p984_p0)
}
 0x14a   : > { %916 = dma.vmem_to_hbm [thread:$0]  (%p1116_p5), %s1269_s24, 16, %s1267_s29, %s652_s5   ;;  %650 = vst [vmem:[%s173_s25] sm:$0x1] %v649_v50 }
 0x14b   : > { %s656_s16 = scalar_lea.sflag [#allocation5], %s1257_s17  ;;  %s988_s30 = scalar_lea.vmem %s1276_s26, 16 }
 0x14c   : > { %p989_p1 = scmp.ne.s32.totalorder %s1276_s26, %s988_s30  ;;  %s1057_s6 = smov [#allocation4]  }
 0x14d   : > { %s992_s7 = sshll.u32 %s1057_s6, 4  ;;  %s993_s7 = int_to_ptr.vmem [resolvable:$false] %s992_s7 }
 0x14e   : > { %p990_p2 = pnand %p989_p1, %p1116_p5  ;;  %s994_s8 = scalar_lea.vmem %s993_s7, 32 }
 0x14f   : > { %p995_p4 = scmp.lt.s32.totalorder %s1276_s26, %s993_s7  ;;  %p996_p7 = scmp.lt.s32.totalorder %s994_s8, %s988_s30 }
 0x150   : > { %p991_p3 = pneg %p990_p2 }
 0x151   : > { %p997_p8 = por %p996_p7, %p995_p4 }
 0x153   : > { %p998_p9 = pnand %p997_p8, %p991_p3 }
 0x155   : > { %1001 = shalt.err (!%p998_p9)
}
 0x156   : > { %s1002_s17 = scalar_lea.hbm %s1274_s4, 16  ;;  %s1006_s29 = scalar_lea.hbm %s1344_s3, 32 }
 0x157   : > { %p1003_p10 = scmp.ne.s32.totalorder %s1274_s4, %s1002_s17  ;;  %p1007_p13 = scmp.lt.u32.totalorder %s1274_s4, %s1344_s3 }
 0x158   : > { %p1008_p0 = scmp.lt.u32.totalorder %s1006_s29, %s1002_s17  ;;  %p1010_p2 = scmp.lt.u32.totalorder %s1002_s17, %s1274_s4 }
 0x159   : > { %p1004_p11 = pnand %p1003_p10, %p1116_p5 }
 0x15a   : > { %p1009_p1 = por %p1008_p0, %p1007_p13 }
 0x15b   : > { %p1005_p12 = pneg %p1004_p11 }
 0x15c   : > { %p1011_p3 = por %p1010_p2, %p1009_p1 }
 0x15e   : > { %p1012_p4 = pnand %p1011_p3, %p1005_p12 }
 0x160   : > { %1015 = shalt.err (!%p1012_p4)
}
 0x161   : > { %917 = dma.vmem_to_hbm [thread:$0]  (%p1116_p5), %s1276_s26, 16, %s1274_s4, %s656_s16  }
 0x162 PF: > { %p927_p7 = scmp.ge.s32.totalorder %s1054_s15, 2  ;;  %s693_s10 = sand.u32 1, %s1042_s12  }
 0x163   : > { %s694_s11 = scalar_lea.sflag [#allocation3], %s693_s10 }
 0x164   : > { %p921_p8 = pnand %p927_p7, %p1120_p6 }
 0x166   : > { %1033 = dma.done.wait (!%p921_p8), %s694_s11, 16  }
 0x167   : > { %1035 = vsyncadd (!%p921_p8), %s694_s11, 4294967280  ;;  %s702_s19 = scalar_lea.sflag [#allocation5], %s693_s10 }
 0x168   : > { %1037 = dma.done.wait (!%p921_p8), %s702_s19, 16  }
 0x169   : > { %1039 = vsyncadd (!%p921_p8), %s702_s19, 4294967280  ;;  %p17_p5 = scmp.ge.s32.totalorder %s1103_s18, 4   ;;  %s1347_s12 = smov %s1046_s13 }
 0x16a   : > { %s1348_s13 = smov %s1050_s14  ;;  %s1349_s14 = smov %s1114_s21 }
 0x16b   : > { %s1350_s15 = smov %s1103_s18  ;;  %19 = sbr.rel (!%p17_p5) target bundleno = 5 (0x5), region = 80 }
 0x172   :  { %706 = vsyncpa [#allocation3], 1 }
 0x173   :  { %708 = vsyncpa [#allocation3 + $0x1], 1 }
 0x174   :  { %709 = vsyncpa [#allocation5], 1 }
 0x175   :  { %711 = vsyncpa [#allocation5 + $0x1], 1 }

</bundles_post_ra>
